<compile_context>
chip_gen: v5e
topology: v5e:2x2
jax: 0.10.0
libtpu: 0.0.40
codegen_flags: <defaults>
</compile_context>

<pallas_src>
import jax
import jax.numpy as jnp
from jax import lax
from jax.experimental import pallas as pl
from jax.experimental.pallas import tpu as pltpu

KH = KW = 3   # kernel_size=3
PAD = 1       # padding=1
STRIDE = 1    # stride=1


def _round_up(x, m):
    return (x + m - 1) // m * m


def convblock_kernel(x_ref, w_ref, b_ref, alpha_ref, o_ref):
    """One grid step: (tm, K) bf16 @ (K, Cout) bf16 -> f32 acc, + bias, PReLU.

    x_ref:     (tm, K)    im2col activation rows, bf16        (VMEM)
    w_ref:     (K, Cout)  packed conv weights, bf16, resident (VMEM)
    b_ref:     (1, Cout)  bias, f32, resident                 (VMEM)
    alpha_ref: (1,)       PReLU slope (single shared param)   (SMEM)
    o_ref:     (tm, Cout) output rows, f32                    (VMEM)
    """
    acc = jnp.dot(x_ref[...], w_ref[...], preferred_element_type=jnp.float32)
    acc = acc + b_ref[...]                        # (tm, Cout) + (1, Cout)
    alpha = alpha_ref[0]                          # scalar from SMEM
    acc = jnp.where(acc >= 0, acc, alpha * acc)   # PReLU (matches torch at 0)
    o_ref[...] = acc.astype(o_ref.dtype)


def convblock_forward(x_nchw, weight, bias, alpha, *, tm_max=1024, target_steps=4):
    """x_nchw: (N, Cin, H, W); weight: (Cout, Cin, KH, KW) torch layout;
    bias: (Cout,); alpha: scalar PReLU slope. Returns (N, Cout, H, W)."""
    N, Cin, H, W = x_nchw.shape
    Cout = weight.shape[0]
    K = KH * KW * Cin

    # ---- layout plumbing in plain JAX (no FLOPs, fuses under jit) ----
    # Cast to bf16 *before* the tap gather so the wrapper's im2col write and
    # the kernel's activation read are both half-width.
    x_nhwc = jnp.transpose(x_nchw, (0, 2, 3, 1)).astype(jnp.bfloat16)     # NHWC
    x_pad = jnp.pad(x_nhwc, ((0, 0), (PAD, PAD), (PAD, PAD), (0, 0)))
    # im2col: (kh, kw) outer, channel inner — must match weight reshape below.
    taps = [x_pad[:, kh:kh + H, kw:kw + W, :]
            for kh in range(KH) for kw in range(KW)]
    patches = jnp.concatenate(taps, axis=-1)                              # (N,H,W,K) bf16

    rows = N * H * W
    # Row tile: >= target_steps grid steps (v7x megacore + per-TC pipelining),
    # capped at tm_max for the single-TC large-size regime; multiple of 32 so
    # the bf16 (16,128) / f32 (8,128) sublane tiling constraint always holds.
    tm = min(tm_max, max(32, _round_up(pl.cdiv(rows, target_steps), 32)))
    rows_p = _round_up(rows, tm)                   # invariant: rows_p % tm == 0
    grid = (rows_p // tm,)

    a = patches.reshape(rows, K)
    a = jnp.pad(a, ((0, rows_p - rows), (0, 0)))                          # (rows_p, K) bf16

    # weight (Cout,Cin,KH,KW) -> (KH,KW,Cin,Cout) -> (K,Cout): matches tap order.
    w_slab = jnp.transpose(weight, (2, 3, 1, 0)).reshape(K, Cout)
    w_slab = w_slab.astype(jnp.bfloat16)                                  # (K, Cout)
    b_row = bias.reshape(1, Cout).astype(jnp.float32)                     # (1, Cout)
    alpha_s = jnp.asarray(alpha, jnp.float32).reshape(1)                  # (1,) SMEM

    out_p = pl.pallas_call(
        convblock_kernel,
        out_shape=jax.ShapeDtypeStruct((rows_p, Cout), jnp.float32),
        grid_spec=pltpu.PrefetchScalarGridSpec(
            num_scalar_prefetch=0,
            grid=grid,
            in_specs=[
                pl.BlockSpec((tm, K), lambda i: (i, 0)),                  # activations
                pl.BlockSpec((K, Cout), lambda i: (0, 0)),                # weights (resident)
                pl.BlockSpec((1, Cout), lambda i: (0, 0)),                # bias (resident)
                pl.BlockSpec(memory_space=pltpu.MemorySpace.SMEM),        # alpha scalar
            ],
            out_specs=pl.BlockSpec((tm, Cout), lambda i: (i, 0)),
        ),
        compiler_params=pltpu.CompilerParams(
            dimension_semantics=("parallel",),
            vmem_limit_bytes=32 * 1024 * 1024,
        ),
    )(a, w_slab, b_row, alpha_s)

    # Narrow (rows, Cout) result -> NHWC -> NCHW (module contract); this is
    # ~16x less data than the previously padded output path.
    out = out_p[:rows].reshape(N, H, W, Cout)
    return jnp.transpose(out, (0, 3, 1, 2)).astype(x_nchw.dtype)


def reference_forward(x_nchw, weight, bias, alpha):
    out = lax.conv_general_dilated(
        x_nchw, weight,
        window_strides=(STRIDE, STRIDE),
        padding=((PAD, PAD), (PAD, PAD)),
        dimension_numbers=("NCHW", "OIHW", "NCHW"),
        precision=lax.Precision.HIGHEST)
    out = out + bias[None, :, None, None]
    return jnp.where(out >= 0, out, jnp.asarray(alpha).reshape(()) * out)


if __name__ == "__main__":
    # Small shapes consistent with the module: N=2, Cin=4, H=W=16, Cout=8.
    N, Cin, H, W, Cout = 2, 4, 16, 16, 8

    key = jax.random.PRNGKey(0)
    kx, kw, kb = jax.random.split(key, 3)

    x = jax.random.normal(kx, (N, Cin, H, W), dtype=jnp.float32)
    # Deterministic param init (torch shapes): weight (Cout,Cin,KH,KW), bias (Cout,)
    fan_in = Cin * KH * KW
    bound = 1.0 / (fan_in ** 0.5)
    weight = jax.random.uniform(kw, (Cout, Cin, KH, KW), jnp.float32, -bound, bound)
    bias = jax.random.uniform(kb, (Cout,), jnp.float32, -bound, bound)
    alpha = jnp.array(0.25, dtype=jnp.float32)   # PReLU default init (num_parameters=1)

    fwd = jax.jit(convblock_forward)
    out = fwd(x, weight, bias, alpha)
    jax.block_until_ready(out)
    assert out.shape == (N, Cout, H, W)

    # Tight check: reference fed the same bf16-rounded matmul operands
    # (isolates layout / im2col-order / bias / PReLU correctness from the
    # deliberate bf16 quantization of the MXU operands).
    x_q = x.astype(jnp.bfloat16).astype(jnp.float32)
    w_q = weight.astype(jnp.bfloat16).astype(jnp.float32)
    ref_q = reference_forward(x_q, w_q, bias, alpha)
    assert jnp.allclose(out, ref_q, atol=1e-4, rtol=1e-4)

    # Loose check vs the full-f32 reference (bf16 operands, f32 accumulate).
    ref = reference_forward(x, weight, bias, alpha)
    assert jnp.allclose(out, ref, atol=5e-2, rtol=5e-2)

    print("KERNEL_OK")
</pallas_src>

<mosaic_0001>
module attributes {stable_mosaic.version = 11 : i64} {
  func.func @convblock_kernel(%arg0: i32, %arg1: memref<128x36xbf16, #tpu.memory_space<vmem>>, %arg2: memref<36x8xbf16, #tpu.memory_space<vmem>>, %arg3: memref<1x8xf32, #tpu.memory_space<vmem>>, %arg4: memref<1xf32, #tpu.memory_space<smem>>, %arg5: memref<128x8xf32, #tpu.memory_space<vmem>>) attributes {dimension_semantics = [#tpu.dimension_semantics<parallel>], iteration_bounds = array<i64: 4>, scalar_prefetch = 0 : i64, scratch_operands = 0 : i64, tpu.core_type = #tpu.core_type<tc>, window_params = [{transform_indices = @transform_0, window_bounds = array<i64: 128, 36>}, {pipeline_mode = #tpu.pipeline_mode<synchronous>, transform_indices = @transform_1, window_bounds = array<i64: 36, 8>}, {pipeline_mode = #tpu.pipeline_mode<synchronous>, transform_indices = @transform_2, window_bounds = array<i64: 1, 8>}, {transform_indices = @transform_3, window_bounds = array<i64: 1>}, {transform_indices = @transform_4, window_bounds = array<i64: 128, 8>}]} {
    %c0 = arith.constant 0 : index
    %c0_0 = arith.constant 0 : index
    %0 = vector.load %arg1[%c0, %c0_0] : memref<128x36xbf16, #tpu.memory_space<vmem>>, vector<128x36xbf16>
    %c0_1 = arith.constant 0 : index
    %c0_2 = arith.constant 0 : index
    %1 = vector.load %arg2[%c0_1, %c0_2] : memref<36x8xbf16, #tpu.memory_space<vmem>>, vector<36x8xbf16>
    %cst = arith.constant dense<0.000000e+00> : vector<128x8xf32>
    %2 = tpu.matmul %0, %1, %cst {dimension_numbers = #tpu.dot_dimension_numbers<[1], [0], [0], [1], [0, 0, 1, 1], [], []>} : vector<128x36xbf16>, vector<36x8xbf16>, vector<128x8xf32> -> vector<128x8xf32>
    %c0_3 = arith.constant 0 : index
    %c0_4 = arith.constant 0 : index
    %3 = vector.load %arg3[%c0_3, %c0_4] : memref<1x8xf32, #tpu.memory_space<vmem>>, vector<1x8xf32>
    %4 = vector.broadcast %3 : vector<1x8xf32> to vector<128x8xf32>
    %5 = arith.addf %2, %4 : vector<128x8xf32>
    %c0_5 = arith.constant 0 : index
    %6 = memref.load %arg4[%c0_5] : memref<1xf32, #tpu.memory_space<smem>>
    %cst_6 = arith.constant 0.000000e+00 : f32
    %7 = vector.broadcast %cst_6 : f32 to vector<128x8xf32>
    %8 = arith.cmpf oge, %5, %7 : vector<128x8xf32>
    %9 = vector.broadcast %6 : f32 to vector<128x8xf32>
    %10 = arith.mulf %9, %5 : vector<128x8xf32>
    %11 = arith.select %8, %5, %10 : vector<128x8xi1>, vector<128x8xf32>
    %c0_7 = arith.constant 0 : index
    %c0_8 = arith.constant 0 : index
    %12 = vector.load %arg5[%c0_7, %c0_8] : memref<128x8xf32, #tpu.memory_space<vmem>>, vector<128x8xf32>
    tpu.vector_store %arg5[%c0_7, %c0_8], %11 {strides = array<i32>} : memref<128x8xf32, #tpu.memory_space<vmem>>, vector<128x8xf32>,
    return
  }
  func.func @transform_0(%arg0: i32) -> (i32, i32) {
    %c0_i32 = arith.constant 0 : i32
    %c0_i32_0 = arith.constant 0 : i32
    return %arg0, %c0_i32 : i32, i32
  }
  func.func @transform_1(%arg0: i32) -> (i32, i32) {
    %c0_i32 = arith.constant 0 : i32
    %c0_i32_0 = arith.constant 0 : i32
    %c0_i32_1 = arith.constant 0 : i32
    return %c0_i32, %c0_i32_0 : i32, i32
  }
  func.func @transform_2(%arg0: i32) -> (i32, i32) {
    %c0_i32 = arith.constant 0 : i32
    %c0_i32_0 = arith.constant 0 : i32
    %c0_i32_1 = arith.constant 0 : i32
    return %c0_i32, %c0_i32_0 : i32, i32
  }
  func.func @transform_3(%arg0: i32) -> i32 {
    %c0_i32 = arith.constant 0 : i32
    %c0_i32_0 = arith.constant 0 : i32
    return %c0_i32 : i32
  }
  func.func @transform_4(%arg0: i32) -> (i32, i32) {
    %c0_i32 = arith.constant 0 : i32
    %c0_i32_0 = arith.constant 0 : i32
    return %arg0, %c0_i32 : i32, i32
  }
}

</mosaic_0001>

<bundles_post_ra>
// kernel: convblock_forward.1
= control target key start
LH: loop header
LB: loop body
LE: loop exit
PB: predicated region body
PF: predicated region fallthrough
CT: control target
= control target key end

     0   :  { %s607_s17 = smov 0   ;;  %s718_s0 = inlined_call_operand.vmem [shape: bf16[512,36], index: 0, kind: input, shape index: {}]   ;;  %s719_s1 = inlined_call_operand.vmem [shape: bf16[36,8], index: 1, kind: input, shape index: {}]   ;;  %s720_s2 = inlined_call_operand.vmem [shape: f32[1,8], index: 2, kind: input, shape index: {}]   ;;  %s721_s3 = inlined_call_operand.<no memory space> [shape: f32[1], index: 3, kind: input, shape index: {}]   ;;  %s722_s4 = inlined_call_operand.vmem [shape: f32[512,8], index: 4, kind: output, shape index: {}]  }
   0x1   :  { %9 = sst [smem:[#allocation2]] %s721_s3 }
   0x2 LB: > { %s484_s18 = sadd.s32 4294967295, %s577_s17   ;;  %p488_p0 = scmp.ge.s32.totalorder %s577_s17, 1  ;;  %s577_s17 = sphi %s607_s17, %s15_s17  }
   0x3   : > { %p164_p1 = scmp.lt.s32.totalorder %s577_s17, 5 }
   0x5   : > { %p165_p2 = pnand %p488_p0, %p164_p1 }
   0x6   : > { %s489_s3 = sshll.u32 (!%p165_p2), %s484_s18, 4  ;;  %s361_s29 = sld [smem:[#allocation2]] (!%p165_p2) }
   0x7   : > { %168 = sbr.rel (%p165_p2) target bundleno = 193 (0xc1), region = 36  ;;  %p191_p3 = scmp.lt.s32.totalorder (!%p165_p2), %s489_s3, 63 }
   0xc   : > { %v223_v0 = vld [vmem:[%s719_s1 + $0x10] sm:$0x3]  ;;  %vm308_vm0 = vcmask 1041408   ;;  %s724_s3 = smov (!%p191_p3, %s489_s3), 63  ;;  %v552_v4 = vld [vmem:[%s719_s1 + $0x8] sm:$0xff]  ;;  %v551_v5 = vld [vmem:[%s719_s1] sm:$0xff]  ;;  %v644_v16 = vstv %s361_s29 }
   0xd   : > { %v277_v1 = vunpack.c.l.b16 %v223_v0  ;;  %s490_s23 = sshll.u32 %s724_s3, 2  ;;  %vm283_vm1 = vcmask 293888   ;;  %v641_v14 = vld [vmem:[%s720_s2] ss:$0 sm:$0xff]  ;;  %s492_s6 = sshll.u32 %s724_s3, 3  ;;  %vm411_vm2 = vcmask 64512  }
   0xe   : > { %s194_s28 = scalar_lea.vmem %s718_s0, %s490_s23  ;;  %s651_s9 = scalar_lea.vmem %s722_s4, %s492_s6 }
   0xf   : > { %v280_v2 = vpack.c.b16 %v277_v1, %v277_v1  ;;  %v543_v6 = vld [vmem:[%s194_s28] sm:$0xff]  ;;  %v545_v7 = vld [vmem:[%s194_s28 + $0x10] sm:$0xff]  ;;  %v544_v10 = vld [vmem:[%s194_s28 + $0x8] sm:$0xff] }
  0x10   : > { %v547_v8 = vld [vmem:[%s194_s28 + $0x20] sm:$0xff]  ;;  %v549_v9 = vld [vmem:[%s194_s28 + $0x30] sm:$0xff]  ;;  %v546_v11 = vld [vmem:[%s194_s28 + $0x18] sm:$0xff] }
  0x11   : > { %v310_v3 = vsel %vm308_vm0, %v280_v2, 0  ;;  %v548_v12 = vld [vmem:[%s194_s28 + $0x28] sm:$0xff]  ;;  %v550_v13 = vld [vmem:[%s194_s28 + $0x38] sm:$0xff] }
  0x12   : > { %317 = vmatpush.bf16.msra.mxu0 %v310_v3  ;;  %553 = vmatpush.bf16.msra.mxu1 %v310_v3 }
  0x13   : > { %554 = vmatpush.bf16.msra.mxu2 %v310_v3  ;;  %555 = vmatpush.bf16.msra.mxu3 %v310_v3 }
  0x16   : > { %318 = vmatpush.bf16.msra.mxu0 %v552_v4  ;;  %556 = vmatpush.bf16.msra.mxu1 %v552_v4 }
  0x17   : > { %557 = vmatpush.bf16.msra.mxu2 %v552_v4  ;;  %558 = vmatpush.bf16.msra.mxu3 %v552_v4 }
  0x1a   : > { %319 = vmatpush.bf16.msra.mxu0 %v551_v5  ;;  %559 = vmatpush.bf16.msra.mxu1 %v551_v5 }
  0x1b   : > { %560 = vmatpush.bf16.msra.mxu2 %v551_v5  ;;  %561 = vmatpush.bf16.msra.mxu3 %v551_v5 }
  0x1d   : > { %533 = vmatmul.msk.bf16.vlgmr.msra.gmra.mxu0 %vm283_vm1, %v543_v6  ;;  %535 = vmatmul.msk.bf16.vlgmr.msra.gmra.mxu1 %vm283_vm1, %v545_v7 }
  0x1e   : > { %537 = vmatmul.msk.bf16.vlgmr.msra.gmra.mxu2 %vm283_vm1, %v547_v8  ;;  %539 = vmatmul.msk.bf16.vlgmr.msra.gmra.mxu3 %vm283_vm1, %v549_v9 }
  0x2d   : > { %534 = vmatmul.msk.bf16.gmra.mxu0 %vm283_vm1, %v544_v10  ;;  %536 = vmatmul.msk.bf16.gmra.mxu1 %vm283_vm1, %v546_v11 }
  0x2e   : > { %538 = vmatmul.msk.bf16.gmra.mxu2 %vm283_vm1, %v548_v12  ;;  %540 = vmatmul.msk.bf16.gmra.mxu3 %vm283_vm1, %v550_v13 }
  0x9a   : > { %v321_v15 = vpop.f32.mrf.mxu0  ;;  %v331_v17 = vpop.f32.mrf.mxu1 }
  0x9b   : > { %v322_v18 = vadd.f32 %v641_v14, %v321_v15  ;;  %v332_v19 = vadd.f32 %v641_v14, %v331_v17 }
  0x9d   : > { %vm362_vm3 = vcmp.ge.f32.partialorder %v322_v18, 0.0  ;;  %v379_v20 = vmul.f32 %v644_v16, %v322_v18  ;;  %vm366_vm4 = vcmp.ge.f32.partialorder %v332_v19, 0.0  ;;  %v383_v21 = vmul.f32 %v644_v16, %v332_v19 }
  0x9f   : > { %v395_v22 = vsel %vm362_vm3, %v322_v18, %v379_v20  ;;  %v399_v23 = vsel %vm366_vm4, %v332_v19, %v383_v21 }
  0xa0   : > { %412 = vst.msk [vmem:[%s651_s9] sm:$0xff] %vm411_vm2, %v395_v22 }
  0xa1   : > { %416 = vst.msk [vmem:[%s651_s9 + $0x20] sm:$0xff] %vm411_vm2, %v399_v23  ;;  %v341_v24 = vpop.f32.mrf.mxu2  ;;  %v351_v25 = vpop.f32.mrf.mxu3 }
  0xa2   : > { %v342_v26 = vadd.f32 %v641_v14, %v341_v24  ;;  %v352_v27 = vadd.f32 %v641_v14, %v351_v25  ;;  %v323_v28 = vpop.f32.mrf.mxu0  ;;  %v333_v29 = vpop.f32.mrf.mxu1 }
  0xa3   : > { %v324_v30 = vadd.f32 %v641_v14, %v323_v28  ;;  %v334_v31 = vadd.f32 %v641_v14, %v333_v29 }
  0xa4   : > { %vm370_vm5 = vcmp.ge.f32.partialorder %v342_v26, 0.0  ;;  %v387_v32 = vmul.f32 %v644_v16, %v342_v26  ;;  %vm374_vm6 = vcmp.ge.f32.partialorder %v352_v27, 0.0  ;;  %v391_v33 = vmul.f32 %v644_v16, %v352_v27 }
  0xa5   : > { %vm363_vm7 = vcmp.ge.f32.partialorder %v324_v30, 0.0  ;;  %v380_v34 = vmul.f32 %v644_v16, %v324_v30  ;;  %vm367_vm8 = vcmp.ge.f32.partialorder %v334_v31, 0.0  ;;  %v384_v35 = vmul.f32 %v644_v16, %v334_v31 }
  0xa6   : > { %v403_v36 = vsel %vm370_vm5, %v342_v26, %v387_v32  ;;  %v407_v37 = vsel %vm374_vm6, %v352_v27, %v391_v33 }
  0xa7   : > { %420 = vst.msk [vmem:[%s651_s9 + $0x40] sm:$0xff] %vm411_vm2, %v403_v36  ;;  %v396_v38 = vsel %vm363_vm7, %v324_v30, %v380_v34  ;;  %v400_v39 = vsel %vm367_vm8, %v334_v31, %v384_v35 }
  0xa8   : > { %424 = vst.msk [vmem:[%s651_s9 + $0x60] sm:$0xff] %vm411_vm2, %v407_v37 }
  0xa9   : > { %413 = vst.msk [vmem:[%s651_s9 + $0x8] sm:$0xff] %vm411_vm2, %v396_v38  ;;  %v343_v40 = vpop.f32.mrf.mxu2  ;;  %v353_v41 = vpop.f32.mrf.mxu3 }
  0xaa   : > { %417 = vst.msk [vmem:[%s651_s9 + $0x28] sm:$0xff] %vm411_vm2, %v400_v39  ;;  %v344_v42 = vadd.f32 %v641_v14, %v343_v40  ;;  %v354_v43 = vadd.f32 %v641_v14, %v353_v41  ;;  %v326_v44 = vpop.f32.mrf.mxu0  ;;  %v336_v45 = vpop.f32.mrf.mxu1 }
  0xab   : > { %v327_v46 = vadd.f32 %v641_v14, %v326_v44  ;;  %v337_v47 = vadd.f32 %v641_v14, %v336_v45 }
  0xac   : > { %vm371_vm9 = vcmp.ge.f32.partialorder %v344_v42, 0.0  ;;  %v388_v48 = vmul.f32 %v644_v16, %v344_v42  ;;  %vm375_vm10 = vcmp.ge.f32.partialorder %v354_v43, 0.0  ;;  %v392_v49 = vmul.f32 %v644_v16, %v354_v43 }
  0xad   : > { %vm364_vm11 = vcmp.ge.f32.partialorder %v327_v46, 0.0  ;;  %v381_v50 = vmul.f32 %v644_v16, %v327_v46  ;;  %vm368_vm12 = vcmp.ge.f32.partialorder %v337_v47, 0.0  ;;  %v385_v51 = vmul.f32 %v644_v16, %v337_v47 }
  0xae   : > { %v404_v52 = vsel %vm371_vm9, %v344_v42, %v388_v48  ;;  %v408_v53 = vsel %vm375_vm10, %v354_v43, %v392_v49 }
  0xaf   : > { %421 = vst.msk [vmem:[%s651_s9 + $0x48] sm:$0xff] %vm411_vm2, %v404_v52  ;;  %v397_v54 = vsel %vm364_vm11, %v327_v46, %v381_v50  ;;  %v401_v55 = vsel %vm368_vm12, %v337_v47, %v385_v51 }
  0xb0   : > { %425 = vst.msk [vmem:[%s651_s9 + $0x68] sm:$0xff] %vm411_vm2, %v408_v53 }
  0xb1   : > { %414 = vst.msk [vmem:[%s651_s9 + $0x10] sm:$0xff] %vm411_vm2, %v397_v54  ;;  %v346_v56 = vpop.f32.mrf.mxu2  ;;  %v356_v57 = vpop.f32.mrf.mxu3 }
  0xb2   : > { %418 = vst.msk [vmem:[%s651_s9 + $0x30] sm:$0xff] %vm411_vm2, %v401_v55  ;;  %v347_v58 = vadd.f32 %v641_v14, %v346_v56  ;;  %v357_v59 = vadd.f32 %v641_v14, %v356_v57  ;;  %v328_v60 = vpop.f32.mrf.mxu0  ;;  %v338_v61 = vpop.f32.mrf.mxu1 }
  0xb3   : > { %v329_v62 = vadd.f32 %v641_v14, %v328_v60  ;;  %v339_v63 = vadd.f32 %v641_v14, %v338_v61 }
  0xb4   : > { %vm372_vm13 = vcmp.ge.f32.partialorder %v347_v58, 0.0  ;;  %v389_v0 = vmul.f32 %v644_v16, %v347_v58  ;;  %vm376_vm14 = vcmp.ge.f32.partialorder %v357_v59, 0.0  ;;  %v393_v1 = vmul.f32 %v644_v16, %v357_v59 }
  0xb5   : > { %vm365_vm15 = vcmp.ge.f32.partialorder %v329_v62, 0.0  ;;  %v382_v2 = vmul.f32 %v644_v16, %v329_v62  ;;  %vm369_vm0 = vcmp.ge.f32.partialorder %v339_v63, 0.0  ;;  %v386_v3 = vmul.f32 %v644_v16, %v339_v63 }
  0xb6   : > { %v405_v4 = vsel %vm372_vm13, %v347_v58, %v389_v0  ;;  %v409_v5 = vsel %vm376_vm14, %v357_v59, %v393_v1 }
  0xb7   : > { %422 = vst.msk [vmem:[%s651_s9 + $0x50] sm:$0xff] %vm411_vm2, %v405_v4  ;;  %v398_v6 = vsel %vm365_vm15, %v329_v62, %v382_v2  ;;  %v402_v7 = vsel %vm369_vm0, %v339_v63, %v386_v3 }
  0xb8   : > { %426 = vst.msk [vmem:[%s651_s9 + $0x70] sm:$0xff] %vm411_vm2, %v409_v5 }
  0xb9   : > { %415 = vst.msk [vmem:[%s651_s9 + $0x18] sm:$0xff] %vm411_vm2, %v398_v6  ;;  %v348_v8 = vpop.f32.mrf.mxu2  ;;  %v358_v9 = vpop.f32.mrf.mxu3 }
  0xba   : > { %419 = vst.msk [vmem:[%s651_s9 + $0x38] sm:$0xff] %vm411_vm2, %v402_v7  ;;  %v349_v10 = vadd.f32 %v641_v14, %v348_v8  ;;  %v359_v11 = vadd.f32 %v641_v14, %v358_v9 }
  0xbc   : > { %vm373_vm1 = vcmp.ge.f32.partialorder %v349_v10, 0.0  ;;  %v390_v12 = vmul.f32 %v644_v16, %v349_v10  ;;  %vm377_vm3 = vcmp.ge.f32.partialorder %v359_v11, 0.0  ;;  %v394_v13 = vmul.f32 %v644_v16, %v359_v11 }
  0xbe   : > { %v406_v15 = vsel %vm373_vm1, %v349_v10, %v390_v12  ;;  %v410_v17 = vsel %vm377_vm3, %v359_v11, %v394_v13 }
  0xbf   : > { %423 = vst.msk [vmem:[%s651_s9 + $0x58] sm:$0xff] %vm411_vm2, %v406_v15 }
  0xc0   : > { %427 = vst.msk [vmem:[%s651_s9 + $0x78] sm:$0xff] %vm411_vm2, %v410_v17 }
  0xc1 PF: > { %s15_s17 = sadd.s32 1, %s577_s17  }
  0xc2   : > { %p12_p4 = scmp.ge.s32.totalorder %s15_s17, 6  }
  0xc4   :  { %14 = sbr.rel (!%p12_p4) target bundleno = 2 (0x2), region = 66 }

</bundles_post_ra>
